<compile_context>
chip_gen: v5e
topology: v5e:2x2
jax: 0.10.0
libtpu: 0.0.40
codegen_flags: <defaults>
</compile_context>

<pallas_src>
import jax
import jax.numpy as jnp
from jax.experimental import pallas as pl
from jax.experimental.pallas import tpu as pltpu


_LANE = 128        # TPU lane width (last-dim tiling unit)
_TB_MAX = 65536    # max batch elements per grid step; sized so double-buffered
                   # blocks (~2.5 MiB for O=4) stay far under v7x's 32 MiB
                   # scoped VMEM while still amortizing the ~0.35 us/step cost.


def _round_up(n, m):
    return ((n + m - 1) // m) * m


def _net_kernel(w1_ref, b1_ref, x_ref, w2_ref, b2_ref, out_ref):
    """One batch tile; batch is mapped to the lane axis.

    w1_ref, b1_ref : SMEM f32[1, 1]   layer1 scalar weight / bias
    x_ref          : VMEM f32[1, TB]  input tile (batch along lanes)
    w2_ref, b2_ref : VMEM f32[O, 1]   layer2 weight / bias (column vectors)
    out_ref        : VMEM f32[O, TB]  transposed output tile (lane-dense)
    """
    w1 = w1_ref[0, 0]
    b1 = b1_ref[0, 0]

    # layer1: Linear(1, 1) + ReLU — K=1 contraction done on the VPU, no MXU.
    h = jnp.maximum(x_ref[...] * w1 + b1, 0.0)              # [1, TB]

    # layer2: Linear(1, O) as an outer-product broadcast:
    #   out[o, b] = w2[o] * h[b] + b2[o]
    out_ref[...] = (w2_ref[...] * h + b2_ref[...]).astype(out_ref.dtype)


def net_forward(x, w1, b1, w2, b2):
    """x: [B, 1]; w1: [1,1]; b1: [1]; w2: [O, 1]; b2: [O] -> [B, O]."""
    B = x.shape[0]
    O = w2.shape[0]

    if x.dtype != jnp.float32:   # guard the cast: no extra HBM pass if already f32
        x = x.astype(jnp.float32)

    # Batch goes on the lane axis: [B, 1] -> [1, B] is a free contiguous
    # reshape.  Pad batch up to a multiple of the tile so blocks are
    # lane-aligned (multiples of 128) and stores are unmasked.
    TB = min(_TB_MAX, _round_up(B, _LANE))
    B_pad = _round_up(B, TB)
    xr = x.reshape(1, B)
    if B_pad != B:
        xr = jnp.pad(xr, ((0, 0), (0, B_pad - B)))

    # Tiny parameters (O-sized glue in plain JAX): scalars -> SMEM,
    # [O, 1] column vectors -> VMEM.
    w1_s = w1.reshape(1, 1).astype(jnp.float32)
    b1_s = b1.reshape(1, 1).astype(jnp.float32)
    w2_m = w2.reshape(O, 1).astype(jnp.float32)
    b2_m = b2.reshape(O, 1).astype(jnp.float32)

    grid = (B_pad // TB,)

    out_t = pl.pallas_call(
        _net_kernel,
        out_shape=jax.ShapeDtypeStruct((O, B_pad), jnp.float32),
        grid=grid,
        in_specs=[
            pl.BlockSpec(memory_space=pltpu.MemorySpace.SMEM),   # w1 scalar
            pl.BlockSpec(memory_space=pltpu.MemorySpace.SMEM),   # b1 scalar
            pl.BlockSpec((1, TB), lambda i: (0, i)),             # x batch tile
            pl.BlockSpec((O, 1), lambda i: (0, 0)),              # w2 column
            pl.BlockSpec((O, 1), lambda i: (0, 0)),              # b2 column
        ],
        out_specs=pl.BlockSpec((O, TB), lambda i: (0, i)),
        compiler_params=pltpu.CompilerParams(
            dimension_semantics=("parallel",),   # shard batch tiles across TCs (v7x)
        ),
    )(w1_s, b1_s, xr, w2_m, b2_m)

    # Layout plumbing back to PyTorch's [B, O]; drops the batch padding.
    return out_t[:, :B].T


def _reference(x, w1, b1, w2, b2):
    h = jnp.maximum(x @ w1.T + b1, 0.0)
    return h @ w2.T + b2


if __name__ == "__main__":
    # Module config consistent with the forward pass: hi_features must be 1.
    in_features, hi_features, out_features = 1, 1, 4
    batch = 8

    key = jax.random.PRNGKey(0)
    kx, kw1, kb1, kw2, kb2 = jax.random.split(key, 5)

    x = jax.random.normal(kx, (batch, in_features), dtype=jnp.float32)

    # Deterministic synthetic parameters (PyTorch-like uniform init bounds).
    w1 = jax.random.uniform(kw1, (1, 1), minval=-1.0, maxval=1.0, dtype=jnp.float32)
    b1 = jax.random.uniform(kb1, (1,), minval=-1.0, maxval=1.0, dtype=jnp.float32)
    bound2 = 1.0 / (hi_features ** 0.5)
    w2 = jax.random.uniform(kw2, (out_features, hi_features),
                            minval=-bound2, maxval=bound2, dtype=jnp.float32)
    b2 = jax.random.uniform(kb2, (out_features,),
                            minval=-bound2, maxval=bound2, dtype=jnp.float32)

    out = net_forward(x, w1, b1, w2, b2)
    out = jax.block_until_ready(out)

    ref = _reference(x, w1, b1, w2, b2)
    assert out.shape == (batch, out_features)
    assert jnp.allclose(out, ref, atol=1e-5, rtol=1e-5)

    print("KERNEL_OK")
</pallas_src>

<mosaic_0001>
module attributes {stable_mosaic.version = 11 : i64} {
  func.func @_net_kernel(%arg0: i32, %arg1: memref<1x1xf32, #tpu.memory_space<smem>>, %arg2: memref<1x1xf32, #tpu.memory_space<smem>>, %arg3: memref<1x128xf32, #tpu.memory_space<vmem>>, %arg4: memref<4x1xf32, #tpu.memory_space<vmem>>, %arg5: memref<4x1xf32, #tpu.memory_space<vmem>>, %arg6: memref<4x128xf32, #tpu.memory_space<vmem>>) attributes {dimension_semantics = [#tpu.dimension_semantics<parallel>], iteration_bounds = array<i64: 1>, scalar_prefetch = 0 : i64, scratch_operands = 0 : i64, tpu.core_type = #tpu.core_type<tc>, window_params = [{transform_indices = @transform_0, window_bounds = array<i64: 1, 1>}, {transform_indices = @transform_1, window_bounds = array<i64: 1, 1>}, {transform_indices = @transform_2, window_bounds = array<i64: 1, 128>}, {pipeline_mode = #tpu.pipeline_mode<synchronous>, transform_indices = @transform_3, window_bounds = array<i64: 4, 1>}, {pipeline_mode = #tpu.pipeline_mode<synchronous>, transform_indices = @transform_4, window_bounds = array<i64: 4, 1>}, {transform_indices = @transform_5, window_bounds = array<i64: 4, 128>}]} {
    %c0 = arith.constant 0 : index
    %c0_0 = arith.constant 0 : index
    %0 = memref.load %arg1[%c0, %c0_0] : memref<1x1xf32, #tpu.memory_space<smem>>
    %c0_1 = arith.constant 0 : index
    %c0_2 = arith.constant 0 : index
    %1 = memref.load %arg2[%c0_1, %c0_2] : memref<1x1xf32, #tpu.memory_space<smem>>
    %c0_3 = arith.constant 0 : index
    %c0_4 = arith.constant 0 : index
    %2 = vector.load %arg3[%c0_3, %c0_4] : memref<1x128xf32, #tpu.memory_space<vmem>>, vector<1x128xf32>
    %3 = vector.broadcast %0 : f32 to vector<1x128xf32>
    %4 = arith.mulf %2, %3 : vector<1x128xf32>
    %5 = vector.broadcast %1 : f32 to vector<1x128xf32>
    %6 = arith.addf %4, %5 : vector<1x128xf32>
    %cst = arith.constant 0.000000e+00 : f32
    %7 = vector.broadcast %cst : f32 to vector<1x128xf32>
    %8 = arith.maximumf %6, %7 : vector<1x128xf32>
    %c0_5 = arith.constant 0 : index
    %c0_6 = arith.constant 0 : index
    %9 = vector.load %arg4[%c0_5, %c0_6] : memref<4x1xf32, #tpu.memory_space<vmem>>, vector<4x1xf32>
    %10 = vector.broadcast %9 : vector<4x1xf32> to vector<4x128xf32>
    %11 = vector.broadcast %8 : vector<1x128xf32> to vector<4x128xf32>
    %12 = arith.mulf %10, %11 : vector<4x128xf32>
    %c0_7 = arith.constant 0 : index
    %c0_8 = arith.constant 0 : index
    %13 = vector.load %arg5[%c0_7, %c0_8] : memref<4x1xf32, #tpu.memory_space<vmem>>, vector<4x1xf32>
    %14 = vector.broadcast %13 : vector<4x1xf32> to vector<4x128xf32>
    %15 = arith.addf %12, %14 : vector<4x128xf32>
    %c0_9 = arith.constant 0 : index
    %c0_10 = arith.constant 0 : index
    %16 = vector.load %arg6[%c0_9, %c0_10] : memref<4x128xf32, #tpu.memory_space<vmem>>, vector<4x128xf32>
    tpu.vector_store %arg6[%c0_9, %c0_10], %15 {strides = array<i32>} : memref<4x128xf32, #tpu.memory_space<vmem>>, vector<4x128xf32>,
    return
  }
  func.func @transform_0(%arg0: i32) -> (i32, i32) {
    %c0_i32 = arith.constant 0 : i32
    %c0_i32_0 = arith.constant 0 : i32
    %c0_i32_1 = arith.constant 0 : i32
    return %c0_i32, %c0_i32_0 : i32, i32
  }
  func.func @transform_1(%arg0: i32) -> (i32, i32) {
    %c0_i32 = arith.constant 0 : i32
    %c0_i32_0 = arith.constant 0 : i32
    %c0_i32_1 = arith.constant 0 : i32
    return %c0_i32, %c0_i32_0 : i32, i32
  }
  func.func @transform_2(%arg0: i32) -> (i32, i32) {
    %c0_i32 = arith.constant 0 : i32
    %c0_i32_0 = arith.constant 0 : i32
    return %c0_i32, %arg0 : i32, i32
  }
  func.func @transform_3(%arg0: i32) -> (i32, i32) {
    %c0_i32 = arith.constant 0 : i32
    %c0_i32_0 = arith.constant 0 : i32
    %c0_i32_1 = arith.constant 0 : i32
    return %c0_i32, %c0_i32_0 : i32, i32
  }
  func.func @transform_4(%arg0: i32) -> (i32, i32) {
    %c0_i32 = arith.constant 0 : i32
    %c0_i32_0 = arith.constant 0 : i32
    %c0_i32_1 = arith.constant 0 : i32
    return %c0_i32, %c0_i32_0 : i32, i32
  }
  func.func @transform_5(%arg0: i32) -> (i32, i32) {
    %c0_i32 = arith.constant 0 : i32
    %c0_i32_0 = arith.constant 0 : i32
    return %c0_i32, %arg0 : i32, i32
  }
}

</mosaic_0001>

<bundles_post_ra>
// kernel: tpu_custom_call.1
= control target key start
LH: loop header
LB: loop body
LE: loop exit
PB: predicated region body
PF: predicated region fallthrough
CT: control target
= control target key end

     0   :  { %v94_v1 = vmov 0   ;;  %s144_s0 = inlined_call_operand.<no memory space> [shape: f32[1,1], index: 0, kind: input, shape index: {}]   ;;  %s145_s1 = inlined_call_operand.<no memory space> [shape: f32[1,1], index: 1, kind: input, shape index: {}]   ;;  %s146_s2 = inlined_call_operand.vmem [shape: f32[1,128], index: 2, kind: input, shape index: {}]   ;;  %s147_s3 = inlined_call_operand.vmem [shape: f32[4,1], index: 3, kind: input, shape index: {}]   ;;  %s148_s4 = inlined_call_operand.vmem [shape: f32[4,1], index: 4, kind: input, shape index: {}]   ;;  %s149_s5 = inlined_call_operand.hbm [shape: f32[4,128], index: 5, kind: output, shape index: {}]  }
   0x1   :  { %v31_v0 = vld [vmem:[%s147_s3] sm:$0xf]  ;;  %67 = vset.pattern.permute.xlu0 %v94_v1 }
   0x2   :  { %12 = vsyncpa [#allocation5], 0  ;;  %34 = vperm.xlu0 %67, %v31_v0   ;;  %v41_v2 = vld [vmem:[%s148_s4] sm:$0xf]  ;;  %v26_v4 = vstv %s144_s0  ;;  %v28_v6 = vstv %s145_s1  ;;  %s95_s27 = smov [#allocation4]   ;;  %s56_s30 = sshll.u32 %s149_s5, 4  ;;  %s57_s30 = int_to_ptr.hbm [resolvable:$true] %s56_s30 }
   0x3   :  { %v25_v3 = vld [vmem:[%s146_s2] sm:$0x1]  ;;  %s54_s4 = sshll.u32 %s95_s27, 4  ;;  %s55_s4 = int_to_ptr.vmem [resolvable:$true] %s54_s4 }
   0x4   :  { %v27_v5 = vmul.f32 %v26_v4, %v25_v3 }
   0x6   :  { %v29_v7 = vadd.f32 %v28_v6, %v27_v5 }
   0x8   :  { %v30_v8 = vmax.f32 %v29_v7, 0.0 }
   0xa   :  { %44 = vperm.xlu0 %67, %v41_v2   ;;  %v38_v10 = vperm.slane %v30_v8, 0 }
  0x74   :  { %v35_v9 = vpop.permute.xlu0 %34 }
  0x75   :  { %v40_v11 = vmul.f32 %v38_v10, %v35_v9 }
  0x7c   :  { %v45_v12 = vpop.permute.xlu0 %44 }
  0x7d   :  { %v47_v13 = vadd.f32 %v45_v12, %v40_v11 }
  0x7f   :  { %48 = vst [vmem:[#allocation4] sm:$0xf] %v47_v13 }
  0x80   :  { %59 = dma.vmem_to_hbm [thread:$0]  %s55_s4, 64, %s57_s30, [#allocation5]  }
  0x81   :  { %92 = dma.done.wait [#allocation5], 64  }
  0x82   :  { %93 = vsyncadd [#allocation5], 4294967232 }
  0x83   :  { %64 = vsyncpa [#allocation5], 1 }

</bundles_post_ra>
